<compile_context>
chip_gen: v5e
topology: v5e:2x2
jax: 0.10.0
libtpu: 0.0.40
codegen_flags: <defaults>
</compile_context>

<pallas_src>
import jax
import jax.numpy as jnp
from jax import lax
from jax.experimental import pallas as pl
from jax.experimental.pallas import tpu as pltpu

LN_EPS = 1e-5      # nn.LayerNorm default eps
DENOM_EPS = 1e-8   # b / (a + 1e-8)
NEG_BIG = -1e30    # exp(NEG_BIG) == 0 in f32; used to zero the upper triangle


def seq_merge_kernel(c_ref, v_ref, w_ref, wdec_ref, bdec_ref, gamma_ref,
                     beta_ref, out_ref, a_state, b_state):
    t_blk = out_ref.shape[0]

    # Reset the recurrent (a, b) carry at the start of each batch row's sequence.
    @pl.when(pl.program_id(1) == 0)
    def _():
        a_state[...] = jnp.zeros_like(a_state)
        b_state[...] = jnp.zeros_like(b_state)

    c = c_ref[...].astype(jnp.float32)                       # (T, D)
    v = v_ref[...].astype(jnp.float32)                       # (T, D)
    w = w_ref[...].astype(jnp.float32)                       # (T, D)

    # ---- decay logits: Linear(D, 1).  Kept as VPU multiply + XLU lane-reduce;
    # an MXU matmul would waste 255/256 output columns. ----
    logits = jnp.sum(w * wdec_ref[...], axis=-1, keepdims=True) + bdec_ref[0]   # (T,1)
    # log(sigmoid(x)) computed stably with only exp/log/abs/min (no log1p):
    logd = jnp.minimum(logits, 0.0) - jnp.log(1.0 + jnp.exp(-jnp.abs(logits)))  # (T,1)

    # ---- Block-parallel scan machinery (all standard iota/reduce/broadcast ops).
    # cumlog_t = sum_{j<=t} log d_j, needed in both column and row layouts. ----
    row = lax.broadcasted_iota(jnp.int32, (t_blk, t_blk), 0)
    col = lax.broadcasted_iota(jnp.int32, (t_blk, t_blk), 1)
    mask = row >= col                                          # lower triangle incl. diag

    # logd replicated into lane layout via a diagonal mask + sublane reduce
    # (avoids any (T,1)->(1,T) transpose).
    logd_row = jnp.sum(jnp.where(row == col, logd, 0.0),
                       axis=0, keepdims=True)                  # (1,T): logd_k
    cumlog_row = jnp.sum(jnp.where(row <= col, logd, 0.0),
                         axis=0, keepdims=True)                # (1,T): cumlog_k
    cumlog_col = jnp.sum(jnp.where(mask, logd_row, 0.0),
                         axis=1, keepdims=True)                # (T,1): cumlog_t

    # L[t,k] = P_t / P_k = exp(cumlog_t - cumlog_k) for k <= t, else 0.
    # In-mask exponents are <= 0, so no overflow; far-apart pairs underflow to 0.
    L = jnp.exp(jnp.where(mask, cumlog_col - cumlog_row, NEG_BIG))   # (T,T)
    P = jnp.exp(cumlog_col)                                          # (T,1) cumulative decay

    # ---- per-step sources (exp(C) is unnormalized, matching the reference; it
    # can overflow f32 for large C exactly like the original module). ----
    exp_c = jnp.exp(c)                                         # (T, D)
    u = exp_c * v                                              # (T, D)
    s = jnp.sum(exp_c, axis=-1, keepdims=True)                 # (T, 1)
    s_row = jnp.sum(jnp.where(row == col, s, 0.0),
                    axis=0, keepdims=True)                     # (1, T)

    # a_t via a masked row-sum (VPU/XLU); b_t via ONE (T,T)@(T,D) MXU matmul.
    a_all = jnp.sum(L * s_row, axis=-1, keepdims=True) + P * a_state[...]        # (T,1)
    b_all = (jnp.dot(L, u, preferred_element_type=jnp.float32)
             + P * b_state[...])                                                 # (T,D)

    # Carry the last timestep of this block to the next sequence block.
    a_state[...] = a_all[t_blk - 1:t_blk, :]
    b_state[...] = b_all[t_blk - 1:t_blk, :]

    # ---- vectorized epilogue: divide + LayerNorm over the whole block ----
    denom = a_all + DENOM_EPS                                  # (T,1), strictly > 0
    inv = pl.reciprocal(denom, approx=True)                    # EUP
    inv = inv * (2.0 - denom * inv)                            # one Newton step -> ~f32 exact
    res = b_all * inv                                          # (T, D)

    mu = jnp.mean(res, axis=-1, keepdims=True)
    var = jnp.mean((res - mu) ** 2, axis=-1, keepdims=True)
    normed = (res - mu) * lax.rsqrt(var + LN_EPS)
    out_ref[...] = (normed * gamma_ref[...] + beta_ref[...]).astype(out_ref.dtype)


def _choose_t_blk(seq_len, cap=256):
    """Largest divisor of seq_len <= cap, preferring multiples of 128, then 8."""
    cap = min(cap, seq_len)
    divs = [d for d in range(1, cap + 1) if seq_len % d == 0]
    for pref in (128, 8, 1):
        good = [d for d in divs if d % pref == 0]
        if good:
            return max(good)
    return max(divs)


def sequence_merging_seq(C, V, W, w_dec, b_dec, gamma, beta, t_blk=None):
    """C, V, W: (B, S, D) float32. Returns (B, S, D) float32."""
    B, S, D = C.shape
    if t_blk is None:
        t_blk = _choose_t_blk(S)
    assert S % t_blk == 0, "seq_len must be divisible by t_blk"

    w_dec2 = w_dec.reshape(1, D).astype(jnp.float32)
    b_dec1 = b_dec.reshape(1).astype(jnp.float32)       # SMEM scalar
    gamma2 = gamma.reshape(1, D).astype(jnp.float32)
    beta2 = beta.reshape(1, D).astype(jnp.float32)

    # One batch row per block (squeezed) -> clean 2-D (T_blk, D) kernel tiles;
    # seq axis sliced from the middle, no wrapper transposes.
    seq_spec = pl.BlockSpec((None, t_blk, D), lambda b, t: (b, t, 0))
    vec_param = pl.BlockSpec((1, D), lambda b, t: (0, 0))

    return pl.pallas_call(
        seq_merge_kernel,
        out_shape=jax.ShapeDtypeStruct((B, S, D), C.dtype),
        grid_spec=pltpu.PrefetchScalarGridSpec(
            num_scalar_prefetch=0,
            grid=(B, S // t_blk),
            in_specs=[
                seq_spec, seq_spec, seq_spec,                       # C, V, W
                vec_param,                                          # decay_net weight (1, D)
                pl.BlockSpec(memory_space=pltpu.MemorySpace.SMEM),  # decay_net bias (scalar)
                vec_param, vec_param,                               # LN gamma, beta
            ],
            out_specs=seq_spec,
            scratch_shapes=[
                pltpu.VMEM((1, 1), jnp.float32),       # a carry (across seq blocks)
                pltpu.VMEM((1, D), jnp.float32),       # b carry (across seq blocks)
            ],
        ),
        compiler_params=pltpu.CompilerParams(
            # Batch axis is independent (-> megacore split on v7x); the seq axis
            # carries the (a, b) recurrence and must stay ordered ("arbitrary").
            dimension_semantics=("parallel", "arbitrary")),
    )(C, V, W, w_dec2, b_dec1, gamma2, beta2)


def reference(C, V, W, w_dec, b_dec, gamma, beta):
    """Pure-JAX reference mirroring the PyTorch forward (serial scan)."""
    B, S, D = C.shape

    def step(carry, xs):
        a, b = carry
        c_t, v_t, w_t = xs
        decay = jax.nn.sigmoid(w_t @ w_dec.reshape(D, 1) + b_dec)   # (B, 1)
        exp_c = jnp.exp(c_t)
        a = decay * a + jnp.sum(exp_c, axis=-1, keepdims=True)
        b = decay * b + exp_c * v_t
        return (a, b), b / (a + DENOM_EPS)

    init = (jnp.zeros((B, 1), jnp.float32), jnp.zeros((B, D), jnp.float32))
    xs = (jnp.swapaxes(C, 0, 1), jnp.swapaxes(V, 0, 1), jnp.swapaxes(W, 0, 1))
    _, outs = lax.scan(step, init, xs)
    res = jnp.swapaxes(outs, 0, 1)                                  # (B, S, D)
    mu = jnp.mean(res, axis=-1, keepdims=True)
    var = jnp.mean((res - mu) ** 2, axis=-1, keepdims=True)
    return (res - mu) / jnp.sqrt(var + LN_EPS) * gamma + beta


if __name__ == "__main__":
    # D = 128 keeps the output store lane-dense; S = 32 with t_blk = 16 gives two
    # sequence blocks per batch row so the cross-block (a, b) carry is exercised.
    B, S, D = 2, 32, 128

    key = jax.random.PRNGKey(0)
    k1, k2, k3, k4, k5 = jax.random.split(key, 5)
    C = jax.random.normal(k1, (B, S, D), jnp.float32)
    V = jax.random.normal(k2, (B, S, D), jnp.float32)
    W = jax.random.normal(k3, (B, S, D), jnp.float32)

    # decay_net: Linear(D, 1); layer_norm: LN(D).
    w_dec = jax.random.normal(k4, (D,), jnp.float32) * 0.1
    b_dec = jax.random.normal(k5, (1,), jnp.float32) * 0.1
    gamma = jnp.ones((D,), jnp.float32)
    beta = jnp.zeros((D,), jnp.float32)

    out = jax.block_until_ready(
        sequence_merging_seq(C, V, W, w_dec, b_dec, gamma, beta, t_blk=16))
    ref = reference(C, V, W, w_dec, b_dec, gamma, beta)

    assert out.shape == (B, S, D) and out.dtype == jnp.float32
    err = jnp.max(jnp.abs(out - ref))
    assert jnp.allclose(out, ref, atol=5e-4, rtol=5e-4), f"max abs err = {err}"
    print("KERNEL_OK")
</pallas_src>

<mosaic_0001>
module attributes {stable_mosaic.version = 11 : i64} {
  func.func @seq_merge_kernel(%arg0: i32, %arg1: i32, %arg2: memref<1x16x128xf32, #tpu.memory_space<vmem>>, %arg3: memref<1x16x128xf32, #tpu.memory_space<vmem>>, %arg4: memref<1x16x128xf32, #tpu.memory_space<vmem>>, %arg5: memref<1x128xf32, #tpu.memory_space<vmem>>, %arg6: memref<1xf32, #tpu.memory_space<smem>>, %arg7: memref<1x128xf32, #tpu.memory_space<vmem>>, %arg8: memref<1x128xf32, #tpu.memory_space<vmem>>, %arg9: memref<1x16x128xf32, #tpu.memory_space<vmem>>, %arg10: memref<1x1xf32, #tpu.memory_space<vmem>>, %arg11: memref<1x128xf32, #tpu.memory_space<vmem>>) attributes {dimension_semantics = [#tpu.dimension_semantics<parallel>, #tpu.dimension_semantics<arbitrary>], iteration_bounds = array<i64: 2, 2>, scalar_prefetch = 0 : i64, scratch_operands = 2 : i64, tpu.core_type = #tpu.core_type<tc>, window_params = [{transform_indices = @transform_0, window_bounds = array<i64: 1, 16, 128>}, {transform_indices = @transform_1, window_bounds = array<i64: 1, 16, 128>}, {transform_indices = @transform_2, window_bounds = array<i64: 1, 16, 128>}, {pipeline_mode = #tpu.pipeline_mode<synchronous>, transform_indices = @transform_3, window_bounds = array<i64: 1, 128>}, {transform_indices = @transform_4, window_bounds = array<i64: 1>}, {pipeline_mode = #tpu.pipeline_mode<synchronous>, transform_indices = @transform_5, window_bounds = array<i64: 1, 128>}, {pipeline_mode = #tpu.pipeline_mode<synchronous>, transform_indices = @transform_6, window_bounds = array<i64: 1, 128>}, {transform_indices = @transform_7, window_bounds = array<i64: 1, 16, 128>}]} {
    %c0_i32 = arith.constant 0 : i32
    %0 = arith.cmpi eq, %arg1, %c0_i32 : i32
    %1 = arith.extui %0 : i1 to i32
    %c0_i32_0 = arith.constant 0 : i32
    %2 = arith.cmpi ne, %1, %c0_i32_0 : i32
    scf.if %2 {
      %cst_49 = arith.constant 0.000000e+00 : f32
      %122 = vector.broadcast %cst_49 : f32 to vector<1x1xf32>
      %c0_50 = arith.constant 0 : index
      %c0_51 = arith.constant 0 : index
      %123 = vector.load %arg10[%c0_50, %c0_51] : memref<1x1xf32, #tpu.memory_space<vmem>>, vector<1x1xf32>
      tpu.vector_store %arg10[%c0_50, %c0_51], %122 {strides = array<i32>} : memref<1x1xf32, #tpu.memory_space<vmem>>, vector<1x1xf32>,
      %cst_52 = arith.constant 0.000000e+00 : f32
      %124 = vector.broadcast %cst_52 : f32 to vector<1x128xf32>
      %c0_53 = arith.constant 0 : index
      %c0_54 = arith.constant 0 : index
      %125 = vector.load %arg11[%c0_53, %c0_54] : memref<1x128xf32, #tpu.memory_space<vmem>>, vector<1x128xf32>
      tpu.vector_store %arg11[%c0_53, %c0_54], %124 {strides = array<i32>} : memref<1x128xf32, #tpu.memory_space<vmem>>, vector<1x128xf32>,
    } else {
    }
    %c0 = arith.constant 0 : index
    %c0_1 = arith.constant 0 : index
    %c0_2 = arith.constant 0 : index
    %3 = vector.load %arg2[%c0, %c0_1, %c0_2] : memref<1x16x128xf32, #tpu.memory_space<vmem>>, vector<1x16x128xf32>
    %4 = vector.shape_cast %3 : vector<1x16x128xf32> to vector<16x128xf32>
    %c0_3 = arith.constant 0 : index
    %c0_4 = arith.constant 0 : index
    %c0_5 = arith.constant 0 : index
    %5 = vector.load %arg3[%c0_3, %c0_4, %c0_5] : memref<1x16x128xf32, #tpu.memory_space<vmem>>, vector<1x16x128xf32>
    %6 = vector.shape_cast %5 : vector<1x16x128xf32> to vector<16x128xf32>
    %c0_6 = arith.constant 0 : index
    %c0_7 = arith.constant 0 : index
    %c0_8 = arith.constant 0 : index
    %7 = vector.load %arg4[%c0_6, %c0_7, %c0_8] : memref<1x16x128xf32, #tpu.memory_space<vmem>>, vector<1x16x128xf32>
    %8 = vector.shape_cast %7 : vector<1x16x128xf32> to vector<16x128xf32>
    %c0_9 = arith.constant 0 : index
    %c0_10 = arith.constant 0 : index
    %9 = vector.load %arg5[%c0_9, %c0_10] : memref<1x128xf32, #tpu.memory_space<vmem>>, vector<1x128xf32>
    %10 = vector.broadcast %9 : vector<1x128xf32> to vector<16x128xf32>
    %11 = arith.mulf %8, %10 : vector<16x128xf32>
    %cst = arith.constant dense<0.000000e+00> : vector<16xf32>
    %12 = vector.multi_reduction <add>, %11, %cst [1] : vector<16x128xf32> to vector<16xf32>
    %13 = vector.shape_cast %12 : vector<16xf32> to vector<16x1xf32>
    %c0_11 = arith.constant 0 : index
    %14 = memref.load %arg6[%c0_11] : memref<1xf32, #tpu.memory_space<smem>>
    %15 = vector.broadcast %14 : f32 to vector<16x1xf32>
    %16 = arith.addf %13, %15 : vector<16x1xf32>
    %cst_12 = arith.constant 0.000000e+00 : f32
    %17 = vector.broadcast %cst_12 : f32 to vector<16x1xf32>
    %18 = arith.minimumf %16, %17 : vector<16x1xf32>
    %19 = math.absf %16 : vector<16x1xf32>
    %cst_13 = arith.constant 0.000000e+00 : f32
    %20 = vector.broadcast %cst_13 : f32 to vector<16x1xf32>
    %21 = arith.subf %20, %19 : vector<16x1xf32>
    %22 = math.exp %21 : vector<16x1xf32>
    %cst_14 = arith.constant 1.000000e+00 : f32
    %23 = vector.broadcast %cst_14 : f32 to vector<16x1xf32>
    %24 = arith.addf %23, %22 : vector<16x1xf32>
    %25 = math.log %24 : vector<16x1xf32>
    %26 = arith.subf %18, %25 : vector<16x1xf32>
    %27 = tpu.iota {dimensions = array<i32: 0>} : vector<16x16xi32>
    %28 = tpu.iota {dimensions = array<i32: 1>} : vector<16x16xi32>
    %29 = arith.cmpi sge, %27, %28 : vector<16x16xi32>
    %30 = arith.cmpi eq, %27, %28 : vector<16x16xi32>
    %cst_15 = arith.constant 0.000000e+00 : f32
    %31 = vector.shape_cast %26 : vector<16x1xf32> to vector<16x1xf32>
    %32 = vector.broadcast %31 : vector<16x1xf32> to vector<16x16xf32>
    %33 = vector.broadcast %cst_15 : f32 to vector<16x16xf32>
    %34 = arith.select %30, %32, %33 : vector<16x16xi1>, vector<16x16xf32>
    %cst_16 = arith.constant dense<0.000000e+00> : vector<16xf32>
    %35 = vector.multi_reduction <add>, %34, %cst_16 [0] : vector<16x16xf32> to vector<16xf32>
    %36 = vector.shape_cast %35 : vector<16xf32> to vector<1x16xf32>
    %37 = arith.cmpi sle, %27, %28 : vector<16x16xi32>
    %cst_17 = arith.constant 0.000000e+00 : f32
    %38 = vector.shape_cast %26 : vector<16x1xf32> to vector<16x1xf32>
    %39 = vector.broadcast %38 : vector<16x1xf32> to vector<16x16xf32>
    %40 = vector.broadcast %cst_17 : f32 to vector<16x16xf32>
    %41 = arith.select %37, %39, %40 : vector<16x16xi1>, vector<16x16xf32>
    %cst_18 = arith.constant dense<0.000000e+00> : vector<16xf32>
    %42 = vector.multi_reduction <add>, %41, %cst_18 [0] : vector<16x16xf32> to vector<16xf32>
    %43 = vector.shape_cast %42 : vector<16xf32> to vector<1x16xf32>
    %cst_19 = arith.constant 0.000000e+00 : f32
    %44 = vector.shape_cast %36 : vector<1x16xf32> to vector<1x16xf32>
    %45 = vector.broadcast %44 : vector<1x16xf32> to vector<16x16xf32>
    %46 = vector.broadcast %cst_19 : f32 to vector<16x16xf32>
    %47 = arith.select %29, %45, %46 : vector<16x16xi1>, vector<16x16xf32>
    %cst_20 = arith.constant dense<0.000000e+00> : vector<16xf32>
    %48 = vector.multi_reduction <add>, %47, %cst_20 [1] : vector<16x16xf32> to vector<16xf32>
    %49 = vector.shape_cast %48 : vector<16xf32> to vector<16x1xf32>
    %50 = vector.broadcast %49 : vector<16x1xf32> to vector<16x16xf32>
    %51 = vector.broadcast %43 : vector<1x16xf32> to vector<16x16xf32>
    %52 = arith.subf %50, %51 : vector<16x16xf32>
    %cst_21 = arith.constant -1.000000e+30 : f32
    %53 = vector.broadcast %cst_21 : f32 to vector<16x16xf32>
    %54 = arith.select %29, %52, %53 : vector<16x16xi1>, vector<16x16xf32>
    %55 = math.exp %54 : vector<16x16xf32>
    %56 = math.exp %49 : vector<16x1xf32>
    %57 = math.exp %4 : vector<16x128xf32>
    %58 = arith.mulf %57, %6 : vector<16x128xf32>
    %cst_22 = arith.constant dense<0.000000e+00> : vector<16xf32>
    %59 = vector.multi_reduction <add>, %57, %cst_22 [1] : vector<16x128xf32> to vector<16xf32>
    %60 = vector.shape_cast %59 : vector<16xf32> to vector<16x1xf32>
    %61 = arith.cmpi eq, %27, %28 : vector<16x16xi32>
    %cst_23 = arith.constant 0.000000e+00 : f32
    %62 = vector.shape_cast %60 : vector<16x1xf32> to vector<16x1xf32>
    %63 = vector.broadcast %62 : vector<16x1xf32> to vector<16x16xf32>
    %64 = vector.broadcast %cst_23 : f32 to vector<16x16xf32>
    %65 = arith.select %61, %63, %64 : vector<16x16xi1>, vector<16x16xf32>
    %cst_24 = arith.constant dense<0.000000e+00> : vector<16xf32>
    %66 = vector.multi_reduction <add>, %65, %cst_24 [0] : vector<16x16xf32> to vector<16xf32>
    %67 = vector.shape_cast %66 : vector<16xf32> to vector<1x16xf32>
    %68 = vector.broadcast %67 : vector<1x16xf32> to vector<16x16xf32>
    %69 = arith.mulf %55, %68 : vector<16x16xf32>
    %cst_25 = arith.constant dense<0.000000e+00> : vector<16xf32>
    %70 = vector.multi_reduction <add>, %69, %cst_25 [1] : vector<16x16xf32> to vector<16xf32>
    %71 = vector.shape_cast %70 : vector<16xf32> to vector<16x1xf32>
    %c0_26 = arith.constant 0 : index
    %c0_27 = arith.constant 0 : index
    %72 = vector.load %arg10[%c0_26, %c0_27] : memref<1x1xf32, #tpu.memory_space<vmem>>, vector<1x1xf32>
    %73 = vector.broadcast %72 : vector<1x1xf32> to vector<16x1xf32>
    %74 = arith.mulf %56, %73 : vector<16x1xf32>
    %75 = arith.addf %71, %74 : vector<16x1xf32>
    %cst_28 = arith.constant dense<0.000000e+00> : vector<16x128xf32>
    %76 = tpu.matmul %55, %58, %cst_28 {dimension_numbers = #tpu.dot_dimension_numbers<[1], [0], [0], [1], [0, 0, 1, 1], [], []>} : vector<16x16xf32>, vector<16x128xf32>, vector<16x128xf32> -> vector<16x128xf32>
    %c0_29 = arith.constant 0 : index
    %c0_30 = arith.constant 0 : index
    %77 = vector.load %arg11[%c0_29, %c0_30] : memref<1x128xf32, #tpu.memory_space<vmem>>, vector<1x128xf32>
    %78 = vector.broadcast %56 : vector<16x1xf32> to vector<16x128xf32>
    %79 = vector.broadcast %77 : vector<1x128xf32> to vector<16x128xf32>
    %80 = arith.mulf %78, %79 : vector<16x128xf32>
    %81 = arith.addf %76, %80 : vector<16x128xf32>
    %82 = vector.extract_strided_slice %75 {offsets = [15, 0], sizes = [1, 1], strides = [1, 1]} : vector<16x1xf32> to vector<1x1xf32>
    %c0_31 = arith.constant 0 : index
    %c0_32 = arith.constant 0 : index
    %83 = vector.load %arg10[%c0_31, %c0_32] : memref<1x1xf32, #tpu.memory_space<vmem>>, vector<1x1xf32>
    tpu.vector_store %arg10[%c0_31, %c0_32], %82 {strides = array<i32>} : memref<1x1xf32, #tpu.memory_space<vmem>>, vector<1x1xf32>,
    %84 = vector.extract_strided_slice %81 {offsets = [15, 0], sizes = [1, 128], strides = [1, 1]} : vector<16x128xf32> to vector<1x128xf32>
    %c0_33 = arith.constant 0 : index
    %c0_34 = arith.constant 0 : index
    %85 = vector.load %arg11[%c0_33, %c0_34] : memref<1x128xf32, #tpu.memory_space<vmem>>, vector<1x128xf32>
    tpu.vector_store %arg11[%c0_33, %c0_34], %84 {strides = array<i32>} : memref<1x128xf32, #tpu.memory_space<vmem>>, vector<1x128xf32>,
    %cst_35 = arith.constant 9.99999993E-9 : f32
    %86 = vector.broadcast %cst_35 : f32 to vector<16x1xf32>
    %87 = arith.addf %75, %86 : vector<16x1xf32>
    %88 = tpu.reciprocal %87 {approx = true} : vector<16x1xf32> -> vector<16x1xf32>
    %89 = arith.mulf %87, %88 : vector<16x1xf32>
    %cst_36 = arith.constant 2.000000e+00 : f32
    %90 = vector.broadcast %cst_36 : f32 to vector<16x1xf32>
    %91 = arith.subf %90, %89 : vector<16x1xf32>
    %92 = arith.mulf %88, %91 : vector<16x1xf32>
    %93 = vector.broadcast %92 : vector<16x1xf32> to vector<16x128xf32>
    %94 = arith.mulf %81, %93 : vector<16x128xf32>
    %cst_37 = arith.constant dense<0.000000e+00> : vector<16xf32>
    %95 = vector.multi_reduction <add>, %94, %cst_37 [1] : vector<16x128xf32> to vector<16xf32>
    %96 = vector.shape_cast %95 : vector<16xf32> to vector<16x1xf32>
    %cst_38 = arith.constant 1.280000e+02 : f32
    %97 = vector.broadcast %cst_38 : f32 to vector<16x1xf32>
    %98 = arith.divf %96, %97 : vector<16x1xf32>
    %99 = vector.broadcast %98 : vector<16x1xf32> to vector<16x128xf32>
    %100 = arith.subf %94, %99 : vector<16x128xf32>
    %101 = arith.mulf %100, %100 : vector<16x128xf32>
    %cst_39 = arith.constant dense<0.000000e+00> : vector<16xf32>
    %102 = vector.multi_reduction <add>, %101, %cst_39 [1] : vector<16x128xf32> to vector<16xf32>
    %103 = vector.shape_cast %102 : vector<16xf32> to vector<16x1xf32>
    %cst_40 = arith.constant 1.280000e+02 : f32
    %104 = vector.broadcast %cst_40 : f32 to vector<16x1xf32>
    %105 = arith.divf %103, %104 : vector<16x1xf32>
    %106 = vector.broadcast %98 : vector<16x1xf32> to vector<16x128xf32>
    %107 = arith.subf %94, %106 : vector<16x128xf32>
    %cst_41 = arith.constant 9.99999974E-6 : f32
    %108 = vector.broadcast %cst_41 : f32 to vector<16x1xf32>
    %109 = arith.addf %105, %108 : vector<16x1xf32>
    %110 = math.rsqrt %109 : vector<16x1xf32>
    %111 = vector.broadcast %110 : vector<16x1xf32> to vector<16x128xf32>
    %112 = arith.mulf %107, %111 : vector<16x128xf32>
    %c0_42 = arith.constant 0 : index
    %c0_43 = arith.constant 0 : index
    %113 = vector.load %arg7[%c0_42, %c0_43] : memref<1x128xf32, #tpu.memory_space<vmem>>, vector<1x128xf32>
    %114 = vector.broadcast %113 : vector<1x128xf32> to vector<16x128xf32>
    %115 = arith.mulf %112, %114 : vector<16x128xf32>
    %c0_44 = arith.constant 0 : index
    %c0_45 = arith.constant 0 : index
    %116 = vector.load %arg8[%c0_44, %c0_45] : memref<1x128xf32, #tpu.memory_space<vmem>>, vector<1x128xf32>
    %117 = vector.broadcast %116 : vector<1x128xf32> to vector<16x128xf32>
    %118 = arith.addf %115, %117 : vector<16x128xf32>
    %c0_46 = arith.constant 0 : index
    %c0_47 = arith.constant 0 : index
    %c0_48 = arith.constant 0 : index
    %119 = vector.load %arg9[%c0_46, %c0_47, %c0_48] : memref<1x16x128xf32, #tpu.memory_space<vmem>>, vector<1x16x128xf32>
    %120 = vector.shape_cast %119 : vector<1x16x128xf32> to vector<16x128xf32>
    %121 = vector.shape_cast %118 : vector<16x128xf32> to vector<1x16x128xf32>
    tpu.vector_store %arg9[%c0_46, %c0_47, %c0_48], %121 {strides = array<i32>} : memref<1x16x128xf32, #tpu.memory_space<vmem>>, vector<1x16x128xf32>,
    return
  }
  func.func @transform_0(%arg0: i32, %arg1: i32) -> (i32, i32, i32) {
    %c0_i32 = arith.constant 0 : i32
    %c0_i32_0 = arith.constant 0 : i32
    return %arg0, %arg1, %c0_i32 : i32, i32, i32
  }
  func.func @transform_1(%arg0: i32, %arg1: i32) -> (i32, i32, i32) {
    %c0_i32 = arith.constant 0 : i32
    %c0_i32_0 = arith.constant 0 : i32
    return %arg0, %arg1, %c0_i32 : i32, i32, i32
  }
  func.func @transform_2(%arg0: i32, %arg1: i32) -> (i32, i32, i32) {
    %c0_i32 = arith.constant 0 : i32
    %c0_i32_0 = arith.constant 0 : i32
    return %arg0, %arg1, %c0_i32 : i32, i32, i32
  }
  func.func @transform_3(%arg0: i32, %arg1: i32) -> (i32, i32) {
    %c0_i32 = arith.constant 0 : i32
    %c0_i32_0 = arith.constant 0 : i32
    %c0_i32_1 = arith.constant 0 : i32
    return %c0_i32, %c0_i32_0 : i32, i32
  }
  func.func @transform_4(%arg0: i32, %arg1: i32) -> i32 {
    %c0_i32 = arith.constant 0 : i32
    %c0_i32_0 = arith.constant 0 : i32
    return %c0_i32 : i32
  }
  func.func @transform_5(%arg0: i32, %arg1: i32) -> (i32, i32) {
    %c0_i32 = arith.constant 0 : i32
    %c0_i32_0 = arith.constant 0 : i32
    %c0_i32_1 = arith.constant 0 : i32
    return %c0_i32, %c0_i32_0 : i32, i32
  }
  func.func @transform_6(%arg0: i32, %arg1: i32) -> (i32, i32) {
    %c0_i32 = arith.constant 0 : i32
    %c0_i32_0 = arith.constant 0 : i32
    %c0_i32_1 = arith.constant 0 : i32
    return %c0_i32, %c0_i32_0 : i32, i32
  }
  func.func @transform_7(%arg0: i32, %arg1: i32) -> (i32, i32, i32) {
    %c0_i32 = arith.constant 0 : i32
    %c0_i32_0 = arith.constant 0 : i32
    return %arg0, %arg1, %c0_i32 : i32, i32, i32
  }
}

</mosaic_0001>

<bundles_post_ra>
// kernel: tpu_custom_call.1
= control target key start
LH: loop header
LB: loop body
LE: loop exit
PB: predicated region body
PF: predicated region fallthrough
CT: control target
= control target key end

     0   :  { %s1500_s0 = inlined_call_operand.hbm [shape: f32[2,32,128], index: 0, kind: input, shape index: {}]   ;;  %s1501_s1 = inlined_call_operand.hbm [shape: f32[2,32,128], index: 1, kind: input, shape index: {}]   ;;  %s1502_s2 = inlined_call_operand.hbm [shape: f32[2,32,128], index: 2, kind: input, shape index: {}]   ;;  %s1503_s3 = inlined_call_operand.vmem [shape: f32[1,128], index: 3, kind: input, shape index: {}]   ;;  %s1504_s4 = inlined_call_operand.<no memory space> [shape: f32[1], index: 4, kind: input, shape index: {}]   ;;  %s1505_s5 = inlined_call_operand.vmem [shape: f32[1,128], index: 5, kind: input, shape index: {}]   ;;  %s1506_s6 = inlined_call_operand.vmem [shape: f32[1,128], index: 6, kind: input, shape index: {}]   ;;  %s1507_s7 = inlined_call_operand.hbm [shape: f32[2,32,128], index: 7, kind: output, shape index: {}]  }
   0x1   :  { %1520 = sst [smem:[#allocation25_spill]] %s1501_s1 }
   0x2   :  { %1521 = sst [smem:[#allocation26_spill]] %s1507_s7 }
   0x3   :  { %12 = sst [smem:[#allocation4]] %s1504_s4 }
   0x4   :  { %13 = vsyncpa [#allocation6], 0 }
   0x5   :  { %15 = vsyncpa [#allocation6 + $0x1], 0 }
   0x6   :  { %16 = vsyncpa [#allocation9], 0 }
   0x7   :  { %18 = vsyncpa [#allocation9 + $0x1], 0 }
   0x8   :  { %19 = vsyncpa [#allocation7], 0 }
   0x9   :  { %21 = vsyncpa [#allocation7 + $0x1], 0  ;;  %s1233_s26 = smov 0   ;;  %s1235_s27 = smov 0  }
   0xa   :  { %s1237_s28 = smov 0   ;;  %s1239_s29 = smov 0  }
   0xb   :  { %s1241_s30 = smov 0   ;;  %s1243_s8 = smov 0  }
   0xc   :  { %s1245_s9 = smov 0   ;;  %s1247_s4 = smov 0  }
   0xd LB: > { %1522 = sst [smem:[#allocation15_spill]] %s1153_s26  ;;  %s1274_s10 = sadd.s32 4294967295, %s1181_s4   ;;  %s1181_s4 = sphi %s1247_s4, %s27_s4   ;;  %s1177_s9 = sphi %s1245_s9, %s1550_s9   ;;  %s1173_s8 = sphi %s1243_s8, %s1549_s8   ;;  %s1169_s30 = sphi %s1241_s30, %s1548_s30   ;;  %s1165_s29 = sphi %s1239_s29, %s1547_s29   ;;  %s1161_s28 = sphi %s1237_s28, %s1546_s28   ;;  %s1157_s27 = sphi %s1235_s27, %s1552_s27   ;;  %s1153_s26 = sphi %s1233_s26, %s1551_s26  }
   0xe   : > { %1523 = sst [smem:[#allocation16_spill]] %s1161_s28  ;;  %s826_s11 = sadd.s32 4294967294, %s1181_s4  }
   0xf   : > { %1524 = sst [smem:[#allocation17_spill]] %s1173_s8  ;;  %s36_s12 = sadd.s32 1, %s1173_s8 }
  0x10   : > { %1525 = sst [smem:[#allocation18_spill]] %s1177_s9  ;;  %s39_s13 = sadd.s32 1, %s1177_s9 }
  0x11   : > { %1526 = sst [smem:[#allocation19_spill]] %s1181_s4  ;;  %p37_p0 = scmp.ge.s32.totalorder %s36_s12, 2 }
  0x12   : > { %s48_s14 = sadd.s32 1, %s1161_s28  ;;  %p55_p1 = scmp.ne.s32.totalorder %s1161_s28, %s1157_s27 }
  0x13   : > { %p56_p2 = scmp.eq.s32.totalorder %s1181_s4, 0  ;;  %s1554_s12 = smov (%p37_p0, %s36_s12), 0 }
  0x14   : > { %1527 = sst [smem:[#allocation20_spill]] %s1554_s12  ;;  %s1556_s13 = smov (!%p37_p0, %s39_s13), %s1177_s9 }
  0x15   : > { %s44_s15 = ssub.s32 %s1173_s8, %s1554_s12  ;;  %p1288_p3 = por %p56_p2, %p55_p1 }
  0x16   : > { %p41_p4 = scmp.ge.s32.totalorder %s1556_s13, 2  ;;  %p61_p5 = scmp.ne.s32.totalorder %s1157_s27, %s1153_s26 }
  0x17   : > { %p62_p6 = scmp.eq.s32.totalorder %s1274_s10, 0  ;;  %p227_p7 = scmp.eq.s32.totalorder %s1274_s10, 3 }
  0x18   : > { %s1558_s13 = smov (%p41_p4, %s1556_s13), 0  ;;  %p233_p10 = scmp.eq.s32.totalorder %s826_s11, 3 }
  0x19   : > { %1529 = sst [smem:[#allocation21_spill]] %s1558_s13  ;;  %p1298_p8 = por %p62_p6, %p61_p5 }
  0x1a   : > { %p1302_p9 = por %p227_p7, %p55_p1  ;;  %s43_s19 = ssub.s32 %s1177_s9, %s1558_s13 }
  0x1b   : > { %s45_s20 = sor.u32 %s44_s15, %s43_s19  ;;  %p1308_p12 = por %p233_p10, %p61_p5 }
  0x1c   : > { %s1531_s18 = scalar_select %p1302_p9, 1, 0 }
  0x1d   : > { %p46_p11 = scmp.eq.s32.totalorder %s45_s20, 0  ;;  %p879_p13 = scmp.lt.s32.totalorder %s1181_s4, 4 }
  0x1e   : > { %1532 = sst [smem:[#allocation22_spill]] %s1531_s18  ;;  %s265_s22 = sand.u32 1, %s1161_s28  }
  0x1f   : > { %s1533_s21 = scalar_select %p1308_p12, 1, 0 }
  0x20   : > { %s1315_s23 = scalar_select %p46_p11, %s1161_s28, %s48_s14  }
  0x21   : > { %1534 = sst [smem:[#allocation23_spill]] %s1533_s21  ;;  %s1317_s24 = sshll.u32 %s265_s22, 4 }
  0x22   : > { %1535 = sst [smem:[#allocation24_spill]] %s1315_s23  ;;  %s830_s25 = sshll.u32 %s1173_s8, 1 }
  0x23   : > { %s831_s12 = sshll.u32 %s1177_s9, 2  ;;  %p1323_p0 = pnand %p879_p13, %p1288_p3 }
  0x24   : > { %s274_s15 = sadd.s32 %s831_s12, %s830_s25  ;;  %s289_s20 = sand.u32 1, %s1181_s4  }
  0x25   : > { %s832_s19 = sshll.u32 %s274_s15, 3  ;;  %s1537_s1 = sld [smem:[#allocation25_spill]] }
  0x26   : > { %s293_s23 = scalar_lea.vmem [#allocation8], %s1317_s24  ;;  %p841_p1 = scmp.ge.s32.totalorder %s1181_s4, 1 }
  0x27   : > { %s303_s28 = sshll.u32 %s293_s23, 4  ;;  %s290_s16 = scalar_lea.sflag [#allocation9], %s289_s20  ;;  %s304_s28 = int_to_ptr.vmem [resolvable:$true] %s303_s28 }
  0x28   : > { %s1183_s9 = smov 128   ;;  %s1184_s8 = smov 8  }
  0x29   : > { %p335_p2 = scmp.lt.s32.totalorder %s1181_s4, 5  ;;  %s276_s23 = scalar_lea.hbm %s1500_s0, %s832_s19 }
  0x2a   : > { %s269_s25 = scalar_lea.vmem [#allocation5], %s1317_s24  ;;  %s266_s20 = scalar_lea.sflag [#allocation6], %s265_s22 }
  0x2b   : > { %s300_s14 = scalar_lea.hbm %s1537_s1, %s832_s19  ;;  %p1336_p3 = pnand %p841_p1, %p335_p2 }
  0x2c   : > { %s301_s26 = sshll.u32 %s300_s14, 4  ;;  %s279_s15 = sshll.u32 %s269_s25, 4  ;;  %s302_s26 = int_to_ptr.hbm [resolvable:$true] %s301_s26  ;;  %s280_s15 = int_to_ptr.vmem [resolvable:$true] %s279_s15 }
  0x2d   : > { %871 = dma.hbm_to_vmem [thread:$0]  (!%p1323_p0), %s302_s26, 256, %s304_s28, %s290_s16, %s1183_s9, %s1183_s9, %s1184_s8  }
  0x2e   : > { %s277_s14 = sshll.u32 %s276_s23, 4  ;;  %s324_s28 = scalar_lea.hbm %s1502_s2, %s832_s19  ;;  %s278_s14 = int_to_ptr.hbm [resolvable:$true] %s277_s14 }
  0x2f   : > { %868 = dma.hbm_to_vmem [thread:$0]  (!%p1323_p0), %s278_s14, 256, %s280_s15, %s266_s20, %s1183_s9, %s1183_s9, %s1184_s8  }
  0x30   : > { %s317_s4 = scalar_lea.vmem [#allocation10], %s1317_s24  ;;  %s325_s7 = sshll.u32 %s324_s28, 4  ;;  %s326_s7 = int_to_ptr.hbm [resolvable:$true] %s325_s7 }
  0x31   : > { %s327_s18 = sshll.u32 %s317_s4, 4  ;;  %339 = sbr.rel (%p1336_p3) target bundleno = 901 (0x385), region = 48  ;;  %s328_s18 = int_to_ptr.vmem [resolvable:$true] %s327_s18 }
  0x32   : > { %874 = dma.hbm_to_vmem [thread:$0]  (!%p1323_p0), %s326_s7, 256, %s328_s18, %s290_s16, %s1183_s9, %s1183_s9, %s1184_s8  }
  0x33   : > { %s1355_s13 = sand.u32 (!%p1336_p3), 1, %s1157_s27  }
  0x34   : > { %s1358_s22 = sshll.u32 (!%p1336_p3), %s1355_s13, 4  ;;  %s342_s1 = scalar_lea.sflag (!%p1336_p3), [#allocation6], %s1355_s13 }
  0x35   : > { %s345_s24 = scalar_lea.vmem (!%p1336_p3), [#allocation5], %s1358_s22 }
  0x36   : > { %1140 = dma.done.wait (%p1298_p8), %s342_s1, 256  }
  0x37   : > { %1142 = vsyncadd (%p1298_p8), %s342_s1, 4294967040  ;;  %s351_s7 = sand.u32 1, %s1274_s10   ;;  %s355_s9 = scalar_lea.vmem [#allocation8], %s1358_s22 }
  0x38   : > { %s352_s8 = scalar_lea.sflag [#allocation9], %s351_s7 }
  0x39   : > { %1144 = dma.done.wait (%p1298_p8), %s352_s8, 512  }
  0x3a   : > { %1146 = vsyncadd (%p1298_p8), %s352_s8, 4294966784  ;;  %s365_s4 = scalar_lea.vmem [#allocation10], %s1358_s22  ;;  %s1374_s18 = scalar_lea.vmem [#allocation11], %s1358_s22 }
  0x3b   : > { %p846_p4 = scmp.ne.s32.totalorder %s1165_s29, 0 }
  0x3d   : > { %414 = sbr.rel (%p846_p4) target bundleno = 69 (0x45), region = 64 }
  0x42   : > { %vm415_vm0 = vcmask 0   ;;  %v1185_v0 = vmov 0.0  }
  0x43   : > { %416 = vst.msk [vmem:[#allocation2] sm:$0x1] %vm415_vm0, %v1185_v0 }
  0x44   : > { %417 = vst [vmem:[#allocation3] sm:$0x1] %v1185_v0 }
  0x45 PF: > { %v422_v1 = vld [vmem:[%s365_s4] sm:$0xff]  ;;  %v954_v2 = vld [vmem:[%s1503_s3] ss:$0 sm:$0xff]  ;;  %s434_s17 = sld [smem:[#allocation4]]  ;;  %v456_v27 = vlaneseq  ;;  %vm467_vm5 = vcmask 130048   ;;  %vm582_vm8 = vcmask 7175  }
  0x46   : > { %v428_v3 = vmul.f32 %v954_v2, %v422_v1  ;;  %v423_v4 = vld [vmem:[%s365_s4 + $0x8] sm:$0xff]  ;;  %v418_v6 = vld [vmem:[%s345_s24] sm:$0xff]  ;;  %s850_s23 = sshll.u32 %s1165_s29, 1  ;;  %s851_s25 = sshll.u32 %s1169_s30, 2 }
  0x47   : > { %v429_v5 = vmul.f32 %v954_v2, %v423_v4  ;;  %v510_v7 = vmul.f32 1.442695, %v418_v6  ;;  %v419_v12 = vld [vmem:[%s345_s24 + $0x8] sm:$0xff]  ;;  %v1387_v30 = vshrl.u32 %v456_v27, 7  ;;  %v1389_v31 = vand.u32 127, %v456_v27  ;;  %v420_v62 = vld [vmem:[%s355_s9] sm:$0xff]  ;;  %s680_s15 = sadd.s32 %s851_s25, %s850_s23 }
  0x48   : > { %430 = vadd.xlane.f32.xlu0 %v428_v3  ;;  %v512_v14 = vmul.f32 1.442695, %v419_v12  ;;  %v421_v60 = vld [vmem:[%s355_s9 + $0x8] sm:$0xff]  ;;  %s852_s14 = sshll.u32 %s680_s15, 3  ;;  %s1539_s28 = sld [smem:[#allocation26_spill]] }
  0x49   : > { %959 = vpow2.f32 %v510_v7  ;;  %v1392_v33 = vadd.s32 8, %v1387_v30  ;;  %vm463_vm1 = vcmp.eq.s32.totalorder %v1387_v30, %v1389_v31  ;;  %vm477_vm2 = vcmp.le.s32.totalorder %v1387_v30, %v1389_v31  ;;  %s683_s29 = sshll.u32 %s1374_s18, 4  ;;  %s669_s7 = scalar_lea.sflag [#allocation7], %s1355_s13  ;;  %s684_s29 = int_to_ptr.vmem [resolvable:$true] %s683_s29 }
  0x4a   : > { %961 = vpow2.f32 %v512_v14  ;;  %vm461_vm6 = vcmp.ge.s32.totalorder %v1387_v30, %v1389_v31 }
  0x4b   : > { %v435_v8 = vstv %s434_s17  ;;  %vm464_vm3 = vcmp.eq.s32.totalorder %v1392_v33, %v1389_v31  ;;  %vm478_vm4 = vcmp.le.s32.totalorder %v1392_v33, %v1389_v31  ;;  %vm462_vm7 = vcmp.ge.s32.totalorder %v1392_v33, %v1389_v31 }
  0x4e   : > { %s1540_s22 = smov %s1539_s28  ;;  %s682_s1 = scalar_lea.hbm %s1539_s28, %s852_s14 }
  0x4f   : > { %v1384_v13 = vpop.eup %959  ;;  %s685_s30 = sshll.u32 %s682_s1, 4  ;;  %s1099_s11 = scalar_lea.hbm %s1540_s22, 64  ;;  %s686_s30 = int_to_ptr.hbm [resolvable:$true] %s685_s30 }
  0x50   : > { %432 = vadd.xlane.f32.xlu0 %v429_v5  ;;  %516 = vadd.xlane.f32.xlu2 %v1384_v13  ;;  %v962_v20 = vpop.eup %961  ;;  %v514_v0 = vmul.f32 %v1384_v13, %v420_v62  ;;  %s1093_s8 = sshra.s32 %s686_s30, 4  ;;  %s1094_s8 = int_to_ptr.hbm [resolvable:$true] %s1093_s8 }
  0x51   : > { %v515_v61 = vmul.f32 %v962_v20, %v421_v60  ;;  %s1095_s9 = scalar_lea.hbm %s1094_s8, 16  ;;  %p1100_p8 = scmp.lt.s32.totalorder %s1094_s8, %s1540_s22 }
  0x52   : > { %p1096_p5 = scmp.ne.s32.totalorder %s1094_s8, %s1095_s9  ;;  %p1101_p10 = scmp.lt.s32.totalorder %s1099_s11, %s1095_s9 }
  0x53   : > { %573 = vmatpush.msra.mxu0 %v515_v61  ;;  %855 = vmatpush.msra.mxu1 %v515_v61 }
  0x54   : > { %p1097_p6 = pnand %p1096_p5, %p1302_p9  ;;  %p1102_p11 = por %p1101_p10, %p1100_p8 }
  0x55   : > { %574 = vmatpush.msra.mxu0 %v514_v0  ;;  %856 = vmatpush.msra.mxu1 %v514_v0 }
  0x56   : > { %p1098_p7 = pneg %p1097_p6 }
  0x58   : > { %518 = vadd.xlane.f32.xlu2 %v962_v20  ;;  %p1103_p13 = pnand %p1102_p11, %p1098_p7 }
  0xbb   : > { %v431_v9 = vpop.xlane.xlu0 %430 }
  0xbc   : > { %v436_v10 = vadd.f32 %v435_v8, %v431_v9 }
  0xbe   : > { %v440_v11 = vand.u32 2147483647, %v436_v10  ;;  %v438_v32 = vmin.f32 %v436_v10, 0.0 }
  0xc0   : > { %v442_v15 = vsub.f32 0.0, %v440_v11 }
  0xc2   : > { %v444_v16 = vmul.f32 1.442695, %v442_v15 }
  0xc3   : > { %v433_v17 = vpop.xlane.xlu0 %432  ;;  %v517_v59 = vpop.xlane.xlu2 %516 }
  0xc4   : > { %963 = vpow2.f32 %v444_v16  ;;  %v437_v18 = vadd.f32 %v435_v8, %v433_v17  ;;  %v520_v2 = vsel %vm463_vm1, %v517_v59, 0.0 }
  0xc5   : > { %v522_v5 = vsel %vm467_vm5, %v520_v2, 0.0 }
  0xc6   : > { %v441_v19 = vand.u32 2147483647, %v437_v18  ;;  %v439_v36 = vmin.f32 %v437_v18, 0.0 }
  0xc8   : > { %v443_v21 = vsub.f32 0.0, %v441_v19 }
  0xca   : > { %v964_v22 = vpop.eup %963  ;;  %v446_v23 = vmul.f32 1.442695, %v443_v21 }
  0xcb   : > { %v448_v24 = vadd.f32 1.0, %v964_v22  ;;  %v519_v63 = vpop.xlane.xlu2 %518 }
  0xcc   : > { %965 = vpow2.f32 %v446_v23  ;;  %v521_v3 = vsel %vm464_vm3, %v519_v63, 0.0 }
  0xcd   : > { %967 = vlog2.f32 %v448_v24  ;;  %v523_v6 = vsel %vm467_vm5, %v521_v3, 0.0 }
  0xce   : > { %v524_v7 = vadd.f32 %v523_v6, %v522_v5 }
  0xd0   : > { %v525_v9 = vrot.slane %v524_v7, 4 }
  0xd2   : > { %v966_v25 = vpop.eup %965  ;;  %v526_v11 = vadd.f32 %v525_v9, %v524_v7 }
  0xd3   : > { %v968_v26 = vpop.eup %967  ;;  %v449_v28 = vadd.f32 1.0, %v966_v25 }
  0xd4   : > { %v451_v29 = vmul.f32 0.6931472, %v968_v26  ;;  %v527_v13 = vrot.slane %v526_v11, 2 }
  0xd5   : > { %969 = vlog2.f32 %v449_v28 }
  0xd6   : > { %v454_v34 = vsub.f32 %v438_v32, %v451_v29  ;;  %v528_v18 = vadd.f32 %v527_v13, %v526_v11 }
  0xd8   : > { %v465_v38 = vsel %vm463_vm1, %v454_v34, 0.0  ;;  %v479_v39 = vsel %vm477_vm2, %v454_v34, 0.0  ;;  %v529_v20 = vrot.slane %v528_v18, 1  ;;  %v1186_v34 = vmov 0  }
  0xd9   : > { %v468_v43 = vsel %vm467_vm5, %v465_v38, 0.0  ;;  %v481_v44 = vsel %vm467_vm5, %v479_v39, 0.0  ;;  %952 = vset.pattern.permute.xlu2 %v1186_v34  ;;  %953 = vset.pattern.permute.xlu0 %v1186_v34 }
  0xda   : > { %v530_v24 = vadd.f32 %v529_v20, %v528_v18 }
  0xdb   : > { %v970_v35 = vpop.eup %969 }
  0xdc   : > { %v453_v37 = vmul.f32 0.6931472, %v970_v35  ;;  %v955_v35 = vld [vmem:[#allocation2] ss:$0 sm:$0xff] }
  0xde   : > { %v455_v40 = vsub.f32 %v439_v36, %v453_v37 }
  0xe0   : > { %v466_v41 = vsel %vm464_vm3, %v455_v40, 0.0  ;;  %v480_v42 = vsel %vm478_vm4, %v455_v40, 0.0 }
  0xe1   : > { %v469_v45 = vsel %vm467_vm5, %v466_v41, 0.0  ;;  %v482_v46 = vsel %vm467_vm5, %v480_v42, 0.0 }
  0xe2   : > { %v470_v47 = vadd.f32 %v469_v45, %v468_v43  ;;  %v483_v48 = vadd.f32 %v482_v46, %v481_v44 }
  0xe4   : > { %v471_v49 = vrot.slane %v470_v47, 4  ;;  %v484_v1 = vrot.slane %v483_v48, 4 }
  0xe6   : > { %v472_v50 = vadd.f32 %v471_v49, %v470_v47  ;;  %v485_v4 = vadd.f32 %v484_v1, %v483_v48  ;;  %v956_v48 = vld [vmem:[#allocation3] ss:$0 sm:$0xff]  ;;  %v1187_v1 = vmov 128.0  }
  0xe8   : > { %v473_v51 = vrot.slane %v472_v50, 2  ;;  %v486_v8 = vrot.slane %v485_v4, 2 }
  0xea   : > { %v474_v52 = vadd.f32 %v473_v51, %v472_v50  ;;  %v487_v10 = vadd.f32 %v486_v8, %v485_v4 }
  0xec   : > { %v475_v53 = vrot.slane %v474_v52, 1  ;;  %v488_v12 = vrot.slane %v487_v10, 1 }
  0xee   : > { %v476_v54 = vadd.f32 %v475_v53, %v474_v52  ;;  %v489_v14 = vadd.f32 %v488_v12, %v487_v10 }
  0xf0   : > { %v490_v55 = vsel %vm461_vm6, %v476_v54, 0.0  ;;  %v491_v57 = vsel %vm462_vm7, %v476_v54, 0.0 }
  0xf1   : > { %v492_v56 = vsel %vm467_vm5, %v490_v55, 0.0  ;;  %v495_v58 = vsel %vm467_vm5, %v491_v57, 0.0 }
  0xf2   : > { %493 = vadd.xlane.f32.xlu1 %v492_v56 }
  0xfa   : > { %496 = vadd.xlane.f32.xlu1 %v495_v58 }
 0x165   : > { %v494_v15 = vpop.xlane.xlu1 %493 }
 0x166   : > { %v498_v16 = vsub.f32 %v494_v15, %v489_v14  ;;  %v506_v31 = vmul.f32 1.442695, %v494_v15 }
 0x168   : > { %v500_v17 = vsel %vm461_vm6, %v498_v16, -1e+30 }
 0x169   : > { %v502_v19 = vmul.f32 1.442695, %v500_v17 }
 0x16b   : > { %971 = vpow2.f32 %v502_v19 }
 0x16d   : > { %v497_v21 = vpop.xlane.xlu1 %496 }
 0x16e   : > { %v499_v22 = vsub.f32 %v497_v21, %v489_v14  ;;  %v508_v33 = vmul.f32 1.442695, %v497_v21 }
 0x170   : > { %v501_v23 = vsel %vm462_vm7, %v499_v22, -1e+30 }
 0x171   : > { %v972_v25 = vpop.eup %971  ;;  %v504_v26 = vmul.f32 1.442695, %v501_v23 }
 0x172   : > { %847 = vmatmul.msk.f32.vlgmr.msra.gmra.mxu0 %vm467_vm5, %v972_v25  ;;  %v531_v27 = vmul.f32 %v972_v25, %v530_v24  ;;  %v957_v25 = vld [vmem:[%s1505_s5] ss:$0 sm:$0xff] }
 0x173   : > { %973 = vpow2.f32 %v504_v26 }
 0x174   : > { %v533_v28 = vsel %vm467_vm5, %v531_v27, 0.0  ;;  %975 = vpow2.f32 %v506_v31 }
 0x175   : > { %534 = vadd.xlane.f32.xlu0 %v533_v28  ;;  %977 = vpow2.f32 %v508_v33  ;;  %v958_v28 = vld [vmem:[%s1506_s6] ss:$0 sm:$0xff] }
 0x179   : > { %v974_v29 = vpop.eup %973 }
 0x17a   : > { %848 = vmatmul.msk.f32.vlgmr.msra.gmra.mxu1 %vm467_vm5, %v974_v29  ;;  %v532_v30 = vmul.f32 %v974_v29, %v530_v24  ;;  %v976_v36 = vpop.eup %975 }
 0x17b   : > { %v543_v37 = vmul.f32 %v976_v36, %v955_v35  ;;  %v978_v41 = vpop.eup %977  ;;  %v551_v59 = vmul.f32 %v976_v36, %v956_v48 }
 0x17c   : > { %v536_v32 = vsel %vm467_vm5, %v532_v30, 0.0  ;;  %v544_v42 = vmul.f32 %v978_v41, %v955_v35  ;;  %v552_v50 = vmul.f32 %v978_v41, %v956_v48 }
 0x17d   : > { %537 = vadd.xlane.f32.xlu1 %v536_v32 }
 0x1e8   : > { %v535_v38 = vpop.xlane.xlu0 %534 }
 0x1e9   : > { %v545_v39 = vadd.f32 %v543_v37, %v535_v38 }
 0x1eb   : > { %v585_v40 = vadd.f32 1e-08, %v545_v39 }
 0x1ed   : > { %979 = vrcp.f32 %v585_v40 }
 0x1ef   : > { %v576_v58 = vpop.f32.mrf.mxu0 }
 0x1f0   : > { %v538_v43 = vpop.xlane.xlu1 %537  ;;  %v577_v60 = vadd.f32 %v576_v58, %v551_v59 }
 0x1f1   : > { %v546_v44 = vadd.f32 %v544_v42, %v538_v43 }
 0x1f3   : > { %v980_v45 = vpop.eup %979  ;;  %583 = vst.msk [vmem:[#allocation2 - $0x7] sm:$0x80] %vm582_vm8, %v546_v44  ;;  %v586_v46 = vadd.f32 1e-08, %v546_v44 }
 0x1f4   : > { %v589_v47 = vmul.f32 %v980_v45, %v585_v40 }
 0x1f5   : > { %981 = vrcp.f32 %v586_v46 }
 0x1f6   : > { %v591_v49 = vsub.f32 2.0, %v589_v47  ;;  %983 = vrcp.f32 %v1187_v1 }
 0x1f7   : > { %v579_v51 = vpop.f32.mrf.mxu1 }
 0x1f8   : > { %v580_v52 = vadd.f32 %v579_v51, %v552_v50  ;;  %v593_v53 = vmul.f32 %v980_v45, %v591_v49 }
 0x1fa   : > { %584 = vst [vmem:[#allocation3 - $0x7] sm:$0x80] %v580_v52  ;;  %597 = vperm.xlu2 %952, %v593_v53  }
 0x1fb   : > { %v982_v54 = vpop.eup %981 }
 0x1fc   : > { %v590_v55 = vmul.f32 %v982_v54, %v586_v46  ;;  %v984_v2 = vpop.eup %983 }
 0x1fd   : > { %v612_v3 = vmul.f32 128.0, %v984_v2  ;;  %vm616_vm9 = vweird.f32 %v984_v2 }
 0x1fe   : > { %v592_v56 = vsub.f32 2.0, %v590_v55 }
 0x1ff   : > { %v613_v4 = vsub.f32 1.0, %v612_v3 }
 0x200   : > { %v594_v57 = vmul.f32 %v982_v54, %v592_v56 }
 0x201   : > { %v614_v5 = vmul.f32 %v984_v2, %v613_v4 }
 0x202   : > { %602 = vperm.xlu0 %953, %v594_v57  }
 0x203   : > { %v615_v6 = vadd.f32 %v984_v2, %v614_v5 }
 0x205   : > { %v617_v7 = vsel %vm616_vm9, %v984_v2, %v615_v6 }
 0x254   : > { %v598_v61 = vpop.permute.xlu2 %597 }
 0x255   : > { %v605_v62 = vmul.f32 %v598_v61, %v577_v60 }
 0x257   : > { %607 = vadd.xlane.f32.xlu1 %v605_v62 }
 0x274   : > { %v603_v63 = vpop.permute.xlu0 %602 }
 0x275   : > { %v606_v0 = vmul.f32 %v603_v63, %v580_v52 }
 0x277   : > { %609 = vadd.xlane.f32.xlu1 %v606_v0 }
 0x2ca   : > { %v608_v8 = vpop.xlane.xlu1 %607 }
 0x2cb   : > { %v618_v9 = vmul.f32 %v617_v7, %v608_v8 }
 0x2cd   : > { %v620_v10 = vsub.f32 %v605_v62, %v618_v9 }
 0x2cf   : > { %v622_v11 = vmul.f32 %v620_v10, %v620_v10 }
 0x2d1   : > { %624 = vadd.xlane.f32.xlu1 %v622_v11 }
 0x2ea   : > { %v610_v12 = vpop.xlane.xlu1 %609 }
 0x2eb   : > { %v619_v13 = vmul.f32 %v617_v7, %v610_v12 }
 0x2ed   : > { %v621_v14 = vsub.f32 %v606_v0, %v619_v13 }
 0x2ef   : > { %v623_v15 = vmul.f32 %v621_v14, %v621_v14 }
 0x2f1   : > { %626 = vadd.xlane.f32.xlu2 %v623_v15 }
 0x344   : > { %v625_v16 = vpop.xlane.xlu1 %624 }
 0x345   : > { %v628_v17 = vmul.f32 %v625_v16, %v617_v7 }
 0x347   : > { %v630_v18 = vadd.f32 1e-05, %v628_v17 }
 0x349   : > { %985 = vrsqrt.f32 %v630_v18  ;;  %vm638_vm11 = vweird.f32 %v630_v18 }
 0x34f   : > { %v986_v19 = vpop.eup %985 }
 0x350   : > { %v633_v20 = vmul.f32 %v986_v19, %v630_v18  ;;  %vm639_vm10 = vweird.f32 %v986_v19 }
 0x351   : > { %vm640_vm12 = vmor %vm638_vm11, %vm639_vm10 }
 0x352   : > { %v634_v21 = vmul.f32 %v986_v19, %v633_v20 }
 0x354   : > { %v635_v22 = vmul.f32 0.5, %v634_v21 }
 0x356   : > { %v636_v23 = vsub.f32 1.5, %v635_v22 }
 0x358   : > { %v637_v24 = vmul.f32 %v986_v19, %v636_v23 }
 0x35a   : > { %v641_v26 = vsel %vm640_vm12, %v986_v19, %v637_v24 }
 0x35b   : > { %v652_v27 = vmul.f32 %v641_v26, %v620_v10 }
 0x35d   : > { %v658_v29 = vmul.f32 %v957_v25, %v652_v27 }
 0x35f   : > { %v664_v30 = vadd.f32 %v958_v28, %v658_v29 }
 0x361   : > { %666 = vst [vmem:[%s1374_s18] sm:$0xff] %v664_v30 }
 0x364   : > { %v627_v32 = vpop.xlane.xlu2 %626 }
 0x365   : > { %v629_v34 = vmul.f32 %v627_v32, %v617_v7 }
 0x367   : > { %v631_v31 = vadd.f32 1e-05, %v629_v34 }
 0x369   : > { %987 = vrsqrt.f32 %v631_v31  ;;  %vm648_vm14 = vweird.f32 %v631_v31 }
 0x36f   : > { %v988_v33 = vpop.eup %987 }
 0x370   : > { %v643_v35 = vmul.f32 %v988_v33, %v631_v31  ;;  %vm649_vm13 = vweird.f32 %v988_v33 }
 0x371   : > { %vm650_vm15 = vmor %vm648_vm14, %vm649_vm13 }
 0x372   : > { %v644_v36 = vmul.f32 %v988_v33, %v643_v35 }
 0x374   : > { %v645_v37 = vmul.f32 0.5, %v644_v36 }
 0x376   : > { %v646_v38 = vsub.f32 1.5, %v645_v37 }
 0x378   : > { %v647_v39 = vmul.f32 %v988_v33, %v646_v38 }
 0x37a   : > { %v651_v40 = vsel %vm650_vm15, %v988_v33, %v647_v39 }
 0x37b   : > { %v653_v41 = vmul.f32 %v651_v40, %v621_v14 }
 0x37d   : > { %v659_v42 = vmul.f32 %v957_v25, %v653_v41 }
 0x37f   : > { %v665_v43 = vadd.f32 %v958_v28, %v659_v42 }
 0x381   : > { %667 = vst [vmem:[%s1374_s18 + $0x8] sm:$0xff] %v665_v43 }
 0x382   : > { %1106 = shalt.err (!%p1103_p13)
}
 0x383   : > { %s1188_s13 = smov 128   ;;  %s1189_s18 = smov 8  }
 0x384   : > { %863 = dma.vmem_to_hbm [thread:$0]  (%p1302_p9), %s684_s29, 256, %s686_s30, %s669_s7, %s1188_s13, %s1188_s13, %s1189_s18  }
 0x385 PF: > { %s1542_s16 = sld [smem:[#allocation19_spill]] }
 0x386   : > { %s1543_s12 = sld [smem:[#allocation15_spill]] }
 0x38b   : > { %p880_p0 = scmp.ge.s32.totalorder %s1542_s16, 2 }
 0x38c   : > { %s700_s23 = sand.u32 1, %s1543_s12  }
 0x38d   : > { %p876_p1 = pnand %p880_p0, %p1308_p12  ;;  %s701_s25 = scalar_lea.sflag [#allocation7], %s700_s23 }
 0x38f   : > { %p877_p2 = pneg %p876_p1 }
 0x391   : > { %1148 = dma.done.wait (%p877_p2), %s701_s25, 256  }
 0x392   : > { %1150 = vsyncadd (%p877_p2), %s701_s25, 4294967040  ;;  %s27_s4 = sadd.s32 1, %s1542_s16   ;;  %s1545_s15 = sld [smem:[#allocation16_spill]] }
 0x393   : > { %p24_p3 = scmp.ge.s32.totalorder %s27_s4, 6   ;;  %s1546_s28 = sld [smem:[#allocation24_spill]] }
 0x394   : > { %s1547_s29 = sld [smem:[#allocation17_spill]]  ;;  %s1551_s26 = smov %s1157_s27 }
 0x395   : > { %s1548_s30 = sld [smem:[#allocation18_spill]]  ;;  %26 = sbr.rel (!%p24_p3) target bundleno = 13 (0xd), region = 121 }
 0x396   : > { %s1549_s8 = sld [smem:[#allocation20_spill]] }
 0x397   : > { %s1550_s9 = sld [smem:[#allocation21_spill]] }
 0x398   : > { %s1552_s27 = smov %s1545_s15 }
 0x39a   :  { %707 = vsyncpa [#allocation6], 1 }
 0x39b   :  { %709 = vsyncpa [#allocation6 + $0x1], 1 }
 0x39c   :  { %710 = vsyncpa [#allocation9], 1 }
 0x39d   :  { %712 = vsyncpa [#allocation9 + $0x1], 1 }
 0x39e   :  { %713 = vsyncpa [#allocation7], 1 }
 0x39f   :  { %715 = vsyncpa [#allocation7 + $0x1], 1 }

</bundles_post_ra>
